<compile_context>
chip_gen: v5e
topology: v5e:2x2
jax: 0.10.0
libtpu: 0.0.40
codegen_flags: <defaults>
</compile_context>

<pallas_src>
import jax
import jax.numpy as jnp
from jax import lax
from jax.experimental import pallas as pl
from jax.experimental.pallas import tpu as pltpu

# --- small hyperparameters consistent with the module's __init__/forward ---
VOCAB_SIZE = 64
EMBED_DIM = 32            # embedding_dim
N_FILTERS = 16            # n_filters
FILTER_SIZES = (3, 5, 7)  # filter_sizes
OUTPUT_DIM = 4            # output_dim
PAD_INDEX = 1             # vocab['<pad>']
BATCH = 2
SEQ_LEN = 16

NEG_BIG = -1e30           # finite "-inf" for masking invalid conv positions


def cnn_kernel(ids_shift_ref, wconv_ref, bconv_ref, mask_ref,
               wfc_ref, bfc_ref, out_ref):
    """one-hot im2col -> fused conv matmul -> mask -> max -> bias/relu -> FC."""
    BLout, KMAX = ids_shift_ref.shape           # (B*Lout, K_max)
    KV, CF = wconv_ref.shape                    # (K_max*V, 3*F)
    V = KV // KMAX
    B, O = out_ref.shape
    Lout = BLout // B

    # ---- one-hot im2col, pure VPU (no gathers, no embedding matmul) ----
    # Row r = b*Lout + p, lane block k holds one_hot(ids[b, p+k]) over the vocab.
    # Padded ids are -1 -> all-zero rows (out-of-range taps contribute nothing;
    # ids outside [0, V) also silently map to zero, unlike nn.Embedding which
    # would raise).
    ids_shift = ids_shift_ref[...]                                   # (BLout, KMAX) i32
    v_iota = lax.broadcasted_iota(jnp.int32, (BLout, V), 1)          # (BLout, V)
    taps = [(ids_shift[:, k:k + 1] == v_iota).astype(jnp.float32)
            for k in range(KMAX)]
    onehot = jnp.concatenate(taps, axis=1)                           # (BLout, KMAX*V)

    # ---- single fused conv matmul (embedding folded into wconv at init) ----
    scores = jnp.dot(onehot, wconv_ref[...],
                     preferred_element_type=jnp.float32)             # (BLout, 3F)
    # Mask positions invalid for each filter size (p >= L-K+1) BEFORE the max.
    scores = scores + mask_ref[...]

    # ---- max over time per batch; bias + ReLU commuted past the max ----
    pooled = jnp.concatenate(
        [jnp.max(scores[b * Lout:(b + 1) * Lout, :], axis=0, keepdims=True)
         for b in range(B)], axis=0)                                 # (B, 3F)
    cat = jnp.maximum(pooled + bconv_ref[...], 0.0)                  # stays in vregs

    # ---- final linear, single write of out_ref ----
    out_ref[...] = (jnp.dot(cat, wfc_ref[...],
                            preferred_element_type=jnp.float32)
                    + bfc_ref[...])                                  # (B, O)


def cnn_forward(ids, kparams):
    B, L = ids.shape
    KMIN, KMAX = min(FILTER_SIZES), max(FILTER_SIZES)
    Lout = L - KMIN + 1

    # Tiny index metadata built in the wrapper: shifted-id table (B*Lout, KMAX),
    # out-of-range taps padded with -1 (=> zero one-hot rows in the kernel).
    ids_pad = jnp.pad(ids.astype(jnp.int32), ((0, 0), (0, KMAX - 1)),
                      constant_values=-1)                            # (B, L+KMAX-1)
    win = jnp.arange(Lout)[:, None] + jnp.arange(KMAX)[None, :]      # (Lout, KMAX)
    ids_shift = ids_pad[:, win].reshape(B * Lout, KMAX)              # (B*Lout, KMAX)

    # Validity mask: 0 where p <= L-K (valid for that filter), -1e30 otherwise.
    pos = jnp.arange(Lout, dtype=jnp.int32)[:, None]                 # (Lout, 1)
    lim = jnp.concatenate([jnp.full((1, N_FILTERS), L - K + 1, jnp.int32)
                           for K in FILTER_SIZES], axis=1)           # (1, 3F)
    mask = jnp.tile(jnp.where(pos < lim, 0.0, NEG_BIG).astype(jnp.float32),
                    (B, 1))                                          # (B*Lout, 3F)

    vmem = pl.BlockSpec(memory_space=pltpu.MemorySpace.VMEM)
    args = (ids_shift, kparams["w_conv"], kparams["b_conv"], mask,
            kparams["w_fc"], kparams["b_fc"])
    return pl.pallas_call(
        cnn_kernel,
        out_shape=jax.ShapeDtypeStruct((B, OUTPUT_DIM), jnp.float32),
        in_specs=[vmem] * len(args),
        out_specs=vmem,
    )(*args)


def init_params(key):
    """PyTorch-layout parameters (used by the pure-JAX reference)."""
    ks = jax.random.split(key, 9)
    emb = 0.1 * jax.random.normal(ks[0], (VOCAB_SIZE, EMBED_DIM), jnp.float32)
    emb = emb.at[PAD_INDEX].set(0.0)  # padding_idx row stays zero, like nn.Embedding
    params = {"embedding": emb}
    for i, K in enumerate(FILTER_SIZES):
        params[f"conv{K}_w"] = 0.1 * jax.random.normal(
            ks[1 + 2 * i], (N_FILTERS, EMBED_DIM, K), jnp.float32)   # (F, E, K) = OIW
        params[f"conv{K}_b"] = 0.1 * jax.random.normal(
            ks[2 + 2 * i], (N_FILTERS,), jnp.float32)
    params["fc_w"] = 0.1 * jax.random.normal(
        ks[7], (OUTPUT_DIM, len(FILTER_SIZES) * N_FILTERS), jnp.float32)
    params["fc_b"] = 0.1 * jax.random.normal(ks[8], (OUTPUT_DIM,), jnp.float32)
    return params


def fuse_params(params):
    """Fold the embedding table into block-stacked conv weights (init-time work).

    W_fused[k*V + v, fi*F + f] = table[v, :] @ conv{K_fi}_w[f, :, k]  (0 if k >= K_fi)
    # For v6e/v7x throughput, cast w_conv / w_fc (and the in-kernel one-hot)
    # to bfloat16 here; kept f32 so the 5e-4 self-check stays tight.
    """
    V, E = params["embedding"].shape
    F, KMAX, NF = N_FILTERS, max(FILTER_SIZES), len(FILTER_SIZES)
    w_fused = jnp.zeros((KMAX * V, NF * F), jnp.float32)
    b_list = []
    for fi, K in enumerate(FILTER_SIZES):
        w_pt = params[f"conv{K}_w"]                                  # (F, E, K)
        for k in range(K):
            blk = params["embedding"] @ w_pt[:, :, k].T              # (V, F)
            w_fused = w_fused.at[k * V:(k + 1) * V, fi * F:(fi + 1) * F].set(blk)
        b_list.append(params[f"conv{K}_b"])
    return {
        "w_conv": w_fused,                                           # (KMAX*V, 3F)
        "b_conv": jnp.concatenate(b_list).reshape(1, NF * F),        # (1, 3F)
        "w_fc": params["fc_w"].T,                                    # (3F, O)
        "b_fc": params["fc_b"].reshape(1, OUTPUT_DIM),               # (1, O)
    }


def reference_forward(ids, params):
    """Pure-JAX reference mirroring the PyTorch forward (NCL conv)."""
    emb = jnp.take(params["embedding"], ids, axis=0)                 # (B, L, E)
    x = jnp.transpose(emb, (0, 2, 1))                                # (B, E, L)
    pooled = []
    for K in FILTER_SIZES:
        out = lax.conv_general_dilated(
            x, params[f"conv{K}_w"], window_strides=(1,), padding="VALID",
            dimension_numbers=("NCW", "OIW", "NCW"))
        out = out + params[f"conv{K}_b"].reshape(1, N_FILTERS, 1)
        out = jnp.maximum(out, 0.0)
        pooled.append(jnp.max(out, axis=-1))                         # max over time
    cat = jnp.concatenate(pooled, axis=-1)                           # (B, 3F)
    return cat @ params["fc_w"].T + params["fc_b"]


if __name__ == "__main__":
    key = jax.random.PRNGKey(0)
    pkey, ikey = jax.random.split(key)
    params = init_params(pkey)
    kparams = fuse_params(params)
    ids = jax.random.randint(ikey, (BATCH, SEQ_LEN), 0, VOCAB_SIZE, dtype=jnp.int32)

    pred = jax.block_until_ready(cnn_forward(ids, kparams))
    ref = jax.block_until_ready(reference_forward(ids, params))

    assert pred.shape == (BATCH, OUTPUT_DIM), pred.shape
    assert jnp.allclose(pred, ref, atol=5e-4, rtol=5e-4), (pred, ref)
    print("KERNEL_OK")
</pallas_src>

<mosaic_0001>
module attributes {stable_mosaic.version = 11 : i64} {
  func.func @cnn_kernel(%arg0: memref<28x7xi32, #tpu.memory_space<vmem>>, %arg1: memref<448x48xf32, #tpu.memory_space<vmem>>, %arg2: memref<1x48xf32, #tpu.memory_space<vmem>>, %arg3: memref<28x48xf32, #tpu.memory_space<vmem>>, %arg4: memref<48x4xf32, #tpu.memory_space<vmem>>, %arg5: memref<1x4xf32, #tpu.memory_space<vmem>>, %arg6: memref<2x4xf32, #tpu.memory_space<vmem>>) attributes {dimension_semantics = [], scalar_prefetch = 0 : i64, scratch_operands = 0 : i64, tpu.core_type = #tpu.core_type<tc>} {
    %c0 = arith.constant 0 : index
    %c0_0 = arith.constant 0 : index
    %0 = vector.load %arg0[%c0, %c0_0] : memref<28x7xi32, #tpu.memory_space<vmem>>, vector<28x7xi32>
    %1 = tpu.iota {dimensions = array<i32: 1>} : vector<28x64xi32>
    %2 = vector.extract_strided_slice %0 {offsets = [0, 0], sizes = [28, 1], strides = [1, 1]} : vector<28x7xi32> to vector<28x1xi32>
    %3 = vector.broadcast %2 : vector<28x1xi32> to vector<28x64xi32>
    %4 = arith.cmpi eq, %3, %1 : vector<28x64xi32>
    %5 = arith.extui %4 : vector<28x64xi1> to vector<28x64xi32>
    %6 = arith.sitofp %5 : vector<28x64xi32> to vector<28x64xf32>
    %7 = vector.extract_strided_slice %0 {offsets = [0, 1], sizes = [28, 1], strides = [1, 1]} : vector<28x7xi32> to vector<28x1xi32>
    %8 = vector.broadcast %7 : vector<28x1xi32> to vector<28x64xi32>
    %9 = arith.cmpi eq, %8, %1 : vector<28x64xi32>
    %10 = arith.extui %9 : vector<28x64xi1> to vector<28x64xi32>
    %11 = arith.sitofp %10 : vector<28x64xi32> to vector<28x64xf32>
    %12 = vector.extract_strided_slice %0 {offsets = [0, 2], sizes = [28, 1], strides = [1, 1]} : vector<28x7xi32> to vector<28x1xi32>
    %13 = vector.broadcast %12 : vector<28x1xi32> to vector<28x64xi32>
    %14 = arith.cmpi eq, %13, %1 : vector<28x64xi32>
    %15 = arith.extui %14 : vector<28x64xi1> to vector<28x64xi32>
    %16 = arith.sitofp %15 : vector<28x64xi32> to vector<28x64xf32>
    %17 = vector.extract_strided_slice %0 {offsets = [0, 3], sizes = [28, 1], strides = [1, 1]} : vector<28x7xi32> to vector<28x1xi32>
    %18 = vector.broadcast %17 : vector<28x1xi32> to vector<28x64xi32>
    %19 = arith.cmpi eq, %18, %1 : vector<28x64xi32>
    %20 = arith.extui %19 : vector<28x64xi1> to vector<28x64xi32>
    %21 = arith.sitofp %20 : vector<28x64xi32> to vector<28x64xf32>
    %22 = vector.extract_strided_slice %0 {offsets = [0, 4], sizes = [28, 1], strides = [1, 1]} : vector<28x7xi32> to vector<28x1xi32>
    %23 = vector.broadcast %22 : vector<28x1xi32> to vector<28x64xi32>
    %24 = arith.cmpi eq, %23, %1 : vector<28x64xi32>
    %25 = arith.extui %24 : vector<28x64xi1> to vector<28x64xi32>
    %26 = arith.sitofp %25 : vector<28x64xi32> to vector<28x64xf32>
    %27 = vector.extract_strided_slice %0 {offsets = [0, 5], sizes = [28, 1], strides = [1, 1]} : vector<28x7xi32> to vector<28x1xi32>
    %28 = vector.broadcast %27 : vector<28x1xi32> to vector<28x64xi32>
    %29 = arith.cmpi eq, %28, %1 : vector<28x64xi32>
    %30 = arith.extui %29 : vector<28x64xi1> to vector<28x64xi32>
    %31 = arith.sitofp %30 : vector<28x64xi32> to vector<28x64xf32>
    %32 = vector.extract_strided_slice %0 {offsets = [0, 6], sizes = [28, 1], strides = [1, 1]} : vector<28x7xi32> to vector<28x1xi32>
    %33 = vector.broadcast %32 : vector<28x1xi32> to vector<28x64xi32>
    %34 = arith.cmpi eq, %33, %1 : vector<28x64xi32>
    %35 = arith.extui %34 : vector<28x64xi1> to vector<28x64xi32>
    %36 = arith.sitofp %35 : vector<28x64xi32> to vector<28x64xf32>
    %37 = tpu.concatenate %6, %11, %16, %21, %26, %31, %36 in 1 : vector<28x64xf32>, vector<28x64xf32>, vector<28x64xf32>, vector<28x64xf32>, vector<28x64xf32>, vector<28x64xf32>, vector<28x64xf32> -> vector<28x448xf32>
    %c0_1 = arith.constant 0 : index
    %c0_2 = arith.constant 0 : index
    %38 = vector.load %arg1[%c0_1, %c0_2] : memref<448x48xf32, #tpu.memory_space<vmem>>, vector<448x48xf32>
    %cst = arith.constant dense<0.000000e+00> : vector<28x48xf32>
    %39 = tpu.matmul %37, %38, %cst {dimension_numbers = #tpu.dot_dimension_numbers<[1], [0], [0], [1], [0, 0, 1, 1], [], []>} : vector<28x448xf32>, vector<448x48xf32>, vector<28x48xf32> -> vector<28x48xf32>
    %c0_3 = arith.constant 0 : index
    %c0_4 = arith.constant 0 : index
    %40 = vector.load %arg3[%c0_3, %c0_4] : memref<28x48xf32, #tpu.memory_space<vmem>>, vector<28x48xf32>
    %41 = arith.addf %39, %40 : vector<28x48xf32>
    %42 = vector.extract_strided_slice %41 {offsets = [0, 0], sizes = [14, 48], strides = [1, 1]} : vector<28x48xf32> to vector<14x48xf32>
    %cst_5 = arith.constant dense<0xFF800000> : vector<48xf32>
    %43 = vector.multi_reduction <maximumf>, %42, %cst_5 [0] : vector<14x48xf32> to vector<48xf32>
    %44 = vector.shape_cast %43 : vector<48xf32> to vector<1x48xf32>
    %45 = vector.extract_strided_slice %41 {offsets = [14, 0], sizes = [14, 48], strides = [1, 1]} : vector<28x48xf32> to vector<14x48xf32>
    %cst_6 = arith.constant dense<0xFF800000> : vector<48xf32>
    %46 = vector.multi_reduction <maximumf>, %45, %cst_6 [0] : vector<14x48xf32> to vector<48xf32>
    %47 = vector.shape_cast %46 : vector<48xf32> to vector<1x48xf32>
    %48 = tpu.concatenate %44, %47 in 0 : vector<1x48xf32>, vector<1x48xf32> -> vector<2x48xf32>
    %c0_7 = arith.constant 0 : index
    %c0_8 = arith.constant 0 : index
    %49 = vector.load %arg2[%c0_7, %c0_8] : memref<1x48xf32, #tpu.memory_space<vmem>>, vector<1x48xf32>
    %50 = vector.broadcast %49 : vector<1x48xf32> to vector<2x48xf32>
    %51 = arith.addf %48, %50 : vector<2x48xf32>
    %cst_9 = arith.constant 0.000000e+00 : f32
    %52 = vector.broadcast %cst_9 : f32 to vector<2x48xf32>
    %53 = arith.maximumf %51, %52 : vector<2x48xf32>
    %c0_10 = arith.constant 0 : index
    %c0_11 = arith.constant 0 : index
    %54 = vector.load %arg4[%c0_10, %c0_11] : memref<48x4xf32, #tpu.memory_space<vmem>>, vector<48x4xf32>
    %cst_12 = arith.constant dense<0.000000e+00> : vector<2x4xf32>
    %55 = tpu.matmul %53, %54, %cst_12 {dimension_numbers = #tpu.dot_dimension_numbers<[1], [0], [0], [1], [0, 0, 1, 1], [], []>} : vector<2x48xf32>, vector<48x4xf32>, vector<2x4xf32> -> vector<2x4xf32>
    %c0_13 = arith.constant 0 : index
    %c0_14 = arith.constant 0 : index
    %56 = vector.load %arg5[%c0_13, %c0_14] : memref<1x4xf32, #tpu.memory_space<vmem>>, vector<1x4xf32>
    %57 = vector.broadcast %56 : vector<1x4xf32> to vector<2x4xf32>
    %58 = arith.addf %55, %57 : vector<2x4xf32>
    %c0_15 = arith.constant 0 : index
    %c0_16 = arith.constant 0 : index
    %59 = vector.load %arg6[%c0_15, %c0_16] : memref<2x4xf32, #tpu.memory_space<vmem>>, vector<2x4xf32>
    tpu.vector_store %arg6[%c0_15, %c0_16], %58 {strides = array<i32>} : memref<2x4xf32, #tpu.memory_space<vmem>>, vector<2x4xf32>,
    return
  }
}

</mosaic_0001>

<bundles_post_ra>
// kernel: tpu_custom_call.1
= control target key start
LH: loop header
LB: loop body
LE: loop exit
PB: predicated region body
PF: predicated region fallthrough
CT: control target
= control target key end

     0   :  { %v653_v1 = vmov 5   ;;  %v654_v2 = vmov 3   ;;  %s1034_s0 = inlined_call_operand.vmem [shape: s32[28,7], index: 0, kind: input, shape index: {}]   ;;  %s1035_s1 = inlined_call_operand.vmem [shape: f32[448,48], index: 1, kind: input, shape index: {}]   ;;  %s1036_s2 = inlined_call_operand.vmem [shape: f32[1,48], index: 2, kind: input, shape index: {}]   ;;  %s1037_s3 = inlined_call_operand.vmem [shape: f32[28,48], index: 3, kind: input, shape index: {}]   ;;  %s1038_s4 = inlined_call_operand.vmem [shape: f32[48,4], index: 4, kind: input, shape index: {}]   ;;  %s1039_s5 = inlined_call_operand.vmem [shape: f32[1,4], index: 5, kind: input, shape index: {}]   ;;  %s1040_s6 = inlined_call_operand.hbm [shape: f32[2,4], index: 6, kind: output, shape index: {}]  }
   0x1   :  { %v24_v0 = vld [vmem:[%s1034_s0] sm:$0xff]  ;;  %573 = vset.pattern.permute.xlu0 %v653_v1  ;;  %575 = vset.pattern.permute.xlu1 %v654_v2 }
   0x2   :  { %103 = vperm.xlu1 %575, %v24_v0   ;;  %151 = vperm.xlu0 %573, %v24_v0  }
   0x3   :  { %11 = vsyncpa [#allocation3], 0  ;;  %v25_v3 = vld [vmem:[%s1034_s0 + $0x8] sm:$0xff]  ;;  %v655_v4 = vmov 1   ;;  %v707_v5 = vld [vmem:[%s1034_s0 + $0x10] sm:$0xff]  ;;  %v656_v7 = vmov 0   ;;  %v28_v14 = vlaneseq }
   0x4   :  { %577 = vset.pattern.permute.xlu2 %v655_v4  ;;  %v715_v6 = vld [vmem:[%s1034_s0 + $0x18] sm:$0xf]  ;;  %v657_v8 = vmov 4   ;;  %v658_v9 = vmov 2   ;;  %v659_v10 = vmov 6   ;;  %v660_v19 = vmov 0.0  }
   0x5   :  { %58 = vperm.xlu2 %577, %v25_v3   ;;  %v728_v17 = vand.u32 127, %v28_v14  ;;  %s661_s0 = smov 64   ;;  %v290_v32 = vld [vmem:[%s1035_s1 + $0xf8] sm:$0xff]  ;;  %v289_v33 = vld [vmem:[%s1035_s1 + $0xf0] sm:$0xff]  ;;  %v288_v37 = vld [vmem:[%s1035_s1 + $0xe8] sm:$0xff]  ;;  %vm246_vm11 = vcmask 523264  }
   0x6   :  { %360 = vmatpush.msra.mxu1 %v290_v32  ;;  %v314_v35 = vld [vmem:[%s1035_s1 + $0x1b8] sm:$0xff]  ;;  %v313_v36 = vld [vmem:[%s1035_s1 + $0x1b0] sm:$0xff]  ;;  %v312_v38 = vld [vmem:[%s1035_s1 + $0x1a8] sm:$0xff]  ;;  %s662_s15 = smov [#allocation2]  }
   0x7   :  { %426 = vmatpush.msra.mxu3 %v314_v35  ;;  %v287_v39 = vld [vmem:[%s1035_s1 + $0xe0] sm:$0xff]  ;;  %v286_v43 = vld [vmem:[%s1035_s1 + $0xd8] sm:$0xff]  ;;  %v273_v47 = vld [vmem:[%s1035_s1 + $0x70] sm:$0xff] }
   0x8   :  { %361 = vmatpush.msra.mxu1 %v289_v33  ;;  %v311_v40 = vld [vmem:[%s1035_s1 + $0x1a0] sm:$0xff]  ;;  %v274_v44 = vld [vmem:[%s1035_s1 + $0x78] sm:$0xff]  ;;  %v305_v50 = vld [vmem:[%s1035_s1 + $0x170] sm:$0xff] }
   0x9   :  { %427 = vmatpush.msra.mxu3 %v313_v36  ;;  %v310_v45 = vld [vmem:[%s1035_s1 + $0x198] sm:$0xff]  ;;  %331 = vmatpush.msra.mxu0 %v274_v44  ;;  %v285_v53 = vld [vmem:[%s1035_s1 + $0xd0] sm:$0xff]  ;;  %v284_v55 = vld [vmem:[%s1035_s1 + $0xc8] sm:$0xff] }
   0xa   :  { %576 = vset.pattern.permute.xlu1 %v653_v1  ;;  %574 = vset.pattern.permute.xlu0 %v655_v4  ;;  %v306_v46 = vld [vmem:[%s1035_s1 + $0x178] sm:$0xff]  ;;  %v309_v54 = vld [vmem:[%s1035_s1 + $0x190] sm:$0xff]  ;;  %v308_v56 = vld [vmem:[%s1035_s1 + $0x188] sm:$0xff] }
   0xb   :  { %154 = vperm.xlu1 %576, %v25_v3   ;;  %55 = vperm.xlu0 %574, %v24_v0   ;;  %v283_v57 = vld [vmem:[%s1035_s1 + $0xc0] sm:$0xff]  ;;  %v282_v62 = vld [vmem:[%s1035_s1 + $0xb8] sm:$0xff]  ;;  %v281_v1 = vld [vmem:[%s1035_s1 + $0xb0] sm:$0xff] }
   0xc   :  { %362 = vmatpush.msra.mxu1 %v288_v37  ;;  %428 = vmatpush.msra.mxu3 %v312_v38  ;;  %v307_v60 = vld [vmem:[%s1035_s1 + $0x180] sm:$0xff]  ;;  %v276_v14 = vld [vmem:[%s1035_s1 + $0x88] sm:$0xff]  ;;  %v262_v38 = vld [vmem:[%s1035_s1 + $0x18] sm:$0xff] }
   0xd   :  { %578 = vset.pattern.permute.xlu2 %v654_v2  ;;  %389 = vmatpush.msra.mxu2 %v306_v46  ;;  %v296_v35 = vld [vmem:[%s1035_s1 + $0x128] sm:$0xff]  ;;  %v263_v36 = vld [vmem:[%s1035_s1 + $0x20] sm:$0xff] }
   0xe   :  { %106 = vperm.xlu2 %578, %v25_v3   ;;  %363 = vmatpush.msra.mxu1 %v287_v39  ;;  %v295_v37 = vld [vmem:[%s1035_s1 + $0x120] sm:$0xff]  ;;  %v294_v39 = vld [vmem:[%s1035_s1 + $0x118] sm:$0xff]  ;;  %v292_v46 = vld [vmem:[%s1035_s1 + $0x108] sm:$0xff] }
   0xf   :  { %429 = vmatpush.msra.mxu3 %v311_v40  ;;  %332 = vmatpush.msra.mxu0 %v273_v47  ;;  %v261_v40 = vld [vmem:[%s1035_s1 + $0x10] sm:$0xff]  ;;  %v259_v47 = vld [vmem:[%s1035_s1] sm:$0xff] }
  0x10   :  { %364 = vmatpush.msra.mxu1 %v286_v43  ;;  %390 = vmatpush.msra.mxu2 %v305_v50 }
  0x11   :  { %430 = vmatpush.msra.mxu3 %v310_v45  ;;  %v260_v45 = vld [vmem:[%s1035_s1 + $0x8] sm:$0xff] }
  0x12   :  { %365 = vmatpush.msra.mxu1 %v285_v53 }
  0x13   :  { %157 = vperm.xlu1 %576, %v707_v5   ;;  %580 = vset.pattern.permute.xlu0 %v654_v2 }
  0x14   :  { %109 = vperm.xlu0 %580, %v707_v5   ;;  %431 = vmatpush.msra.mxu3 %v309_v54 }
  0x15   :  { %366 = vmatpush.msra.mxu1 %v284_v55 }
  0x16   :  { %579 = vset.pattern.permute.xlu2 %v655_v4  ;;  %432 = vmatpush.msra.mxu3 %v308_v56  ;;  %v279_v4 = vld [vmem:[%s1035_s1 + $0xa0] sm:$0xff] }
  0x17   :  { %61 = vperm.xlu2 %579, %v707_v5   ;;  %367 = vmatpush.msra.mxu1 %v283_v57 }
  0x18   :  { %433 = vmatpush.msra.mxu3 %v307_v60 }
  0x19   :  { %368 = vmatpush.msra.mxu1 %v282_v62 }
  0x1b   :  { %160 = vperm.xlu1 %576, %v715_v6   ;;  %369 = vmatpush.msra.mxu1 %v281_v1 }
  0x1c   :  { %583 = vset.pattern.permute.xlu0 %v656_v7 }
  0x1d   :  { %31 = vperm.xlu0 %583, %v24_v0  }
  0x1f   :  { %64 = vperm.xlu2 %579, %v715_v6  }
  0x23   :  { %581 = vset.pattern.permute.xlu1 %v654_v2 }
  0x24   :  { %112 = vperm.xlu1 %581, %v715_v6  }
  0x25   :  { %586 = vset.pattern.permute.xlu0 %v657_v8 }
  0x26   :  { %130 = vperm.xlu0 %586, %v25_v3  }
  0x27   :  { %582 = vset.pattern.permute.xlu2 %v657_v8 }
  0x28   :  { %127 = vperm.xlu2 %582, %v24_v0  }
  0x2c   :  { %585 = vset.pattern.permute.xlu1 %v658_v9 }
  0x2d   :  { %79 = vperm.xlu1 %585, %v24_v0  }
  0x2e   :  { %133 = vperm.xlu0 %586, %v707_v5  }
  0x30   :  { %584 = vset.pattern.permute.xlu2 %v659_v10 }
  0x31   :  { %175 = vperm.xlu2 %584, %v24_v0  }
  0x35   :  { %587 = vset.pattern.permute.xlu1 %v656_v7 }
  0x36   :  { %34 = vperm.xlu1 %587, %v25_v3   ;;  %595 = vset.pattern.permute.xlu0 %v659_v10 }
  0x37   :  { %181 = vperm.xlu0 %595, %v707_v5  }
  0x39   :  { %178 = vperm.xlu2 %584, %v25_v3  }
  0x3e   :  { %588 = vset.pattern.permute.xlu1 %v658_v9 }
  0x3f   :  { %82 = vperm.xlu1 %588, %v25_v3   ;;  %184 = vperm.xlu0 %595, %v715_v6   ;;  %v280_v3 = vld [vmem:[%s1035_s1 + $0xa8] sm:$0xff] }
  0x40   :  { %370 = vmatpush.msra.mxu1 %v280_v3 }
  0x41   :  { %598 = vset.pattern.permute.xlu2 %v656_v7 }
  0x42   :  { %40 = vperm.xlu2 %598, %v715_v6   ;;  %371 = vmatpush.msra.mxu1 %v279_v4 }
  0x47   :  { %594 = vset.pattern.permute.xlu1 %v656_v7 }
  0x5f   :  { %v59_v11 = vpop.permute.xlu2 %58 }
  0x60   :  { %vm67_vm4 = vcmp.eq.s32.totalorder %v59_v11, %v728_v17  ;;  %v278_v11 = vld [vmem:[%s1035_s1 + $0x98] sm:$0xff] }
  0x61   :  { %v535_v28 = vsel %vm67_vm4, 1.0, %v660_v19  ;;  %372 = vmatpush.msra.mxu1 %v278_v11 }
  0x68   :  { %v107_v12 = vpop.permute.xlu2 %106 }
  0x69   :  { %vm115_vm5 = vcmp.eq.s32.totalorder %v107_v12, %v728_v17 }
  0x6a   :  { %v543_v29 = vsel %vm115_vm5, 1.0, %v660_v19 }
  0x6b   :  { %v604_v34 = vpack.i.bf16 %v543_v29, %v535_v28  ;;  %v298_v28 = vld [vmem:[%s1035_s1 + $0x138] sm:$0xff]  ;;  %v265_v29 = vld [vmem:[%s1035_s1 + $0x30] sm:$0xff] }
  0x71   :  { %v62_v13 = vpop.permute.xlu2 %61 }
  0x72   :  { %vm68_vm6 = vcmp.eq.s32.totalorder %v62_v13, %v728_v17  ;;  %v277_v13 = vld [vmem:[%s1035_s1 + $0x90] sm:$0xff] }
  0x73   :  { %v536_v41 = vsel %vm68_vm6, 1.0, %v660_v19  ;;  %373 = vmatpush.msra.mxu1 %v277_v13 }
  0x74   :  { %v152_v15 = vpop.permute.xlu0 %151  ;;  %v104_v16 = vpop.permute.xlu1 %103 }
  0x75   :  { %vm114_vm0 = vcmp.eq.s32.totalorder %v104_v16, %v728_v17  ;;  %vm162_vm1 = vcmp.eq.s32.totalorder %v152_v15, %v728_v17  ;;  %v304_v15 = vld [vmem:[%s1035_s1 + $0x168] sm:$0xff]  ;;  %374 = vmatpush.msra.mxu1 %v276_v14  ;;  %v303_v16 = vld [vmem:[%s1035_s1 + $0x160] sm:$0xff] }
  0x76   :  { %v542_v20 = vsel %vm114_vm0, 1.0, %v660_v19  ;;  %v550_v23 = vsel %vm162_vm1, 1.0, %v660_v19  ;;  %391 = vmatpush.msra.mxu2 %v304_v15 }
  0x78   :  { %392 = vmatpush.msra.mxu2 %v303_v16 }
  0x79   :  { %v732_v18 = vpop.permute.xlu2 %64 }
  0x7a   :  { %vm69_vm12 = vcmp.eq.s32.totalorder %v732_v18, %v728_v17  ;;  %v270_v18 = vld [vmem:[%s1035_s1 + $0x58] sm:$0xff] }
  0x7d   :  { %v155_v21 = vpop.permute.xlu1 %154  ;;  %v56_v22 = vpop.permute.xlu0 %55 }
  0x7e   :  { %vm163_vm2 = vcmp.eq.s32.totalorder %v155_v21, %v728_v17  ;;  %vm66_vm3 = vcmp.eq.s32.totalorder %v56_v22, %v728_v17  ;;  %v269_v21 = vld [vmem:[%s1035_s1 + $0x50] sm:$0xff] }
  0x7f   :  { %v551_v24 = vsel %vm163_vm2, 1.0, %v660_v19  ;;  %v534_v25 = vsel %vm66_vm3, 1.0, %v660_v19  ;;  %v301_v22 = vld [vmem:[%s1035_s1 + $0x150] sm:$0xff] }
  0x80   :  { %v599_v26 = vpack.i.bf16 %v551_v24, %v542_v20  ;;  %v589_v27 = vpack.i.bf16 %v534_v25, %v550_v23  ;;  %v302_v20 = vld [vmem:[%s1035_s1 + $0x158] sm:$0xff]  ;;  %v268_v23 = vld [vmem:[%s1035_s1 + $0x48] sm:$0xff]  ;;  %v267_v25 = vld [vmem:[%s1035_s1 + $0x40] sm:$0xff] }
  0x81   :  { %393 = vmatpush.msra.mxu2 %v302_v20  ;;  %v300_v24 = vld [vmem:[%s1035_s1 + $0x148] sm:$0xff] }
  0x82   :  { %600 = vrot.lane.b32.xlu2 %v599_v26, %s661_s0  ;;  %590 = vrot.lane.b32.xlu1 %v589_v27, %s661_s0  ;;  %v746_v31 = vpop.permute.xlu2 %127  ;;  %v299_v26 = vld [vmem:[%s1035_s1 + $0x140] sm:$0xff]  ;;  %v266_v27 = vld [vmem:[%s1035_s1 + $0x38] sm:$0xff] }
  0x83   :  { %394 = vmatpush.msra.mxu2 %v301_v22  ;;  %vm138_vm4 = vcmp.eq.s32.totalorder %v746_v31, %v728_v17 }
  0x84   :  { %v546_v4 = vsel %vm138_vm4, 1.0, %v660_v19 }
  0x85   :  { %v158_v30 = vpop.permute.xlu1 %157  ;;  %395 = vmatpush.msra.mxu2 %v300_v24 }
  0x86   :  { %vm164_vm7 = vcmp.eq.s32.totalorder %v158_v30, %v728_v17  ;;  %v110_v49 = vpop.permute.xlu0 %109  ;;  %v297_v30 = vld [vmem:[%s1035_s1 + $0x130] sm:$0xff] }
  0x87   :  { %v552_v42 = vsel %vm164_vm7, 1.0, %v660_v19  ;;  %vm116_vm9 = vcmp.eq.s32.totalorder %v110_v49, %v728_v17  ;;  %396 = vmatpush.msra.mxu2 %v299_v26 }
  0x88   :  { %v609_v51 = vpack.i.bf16 %v536_v41, %v552_v42  ;;  %v544_v59 = vsel %vm116_vm9, 1.0, %v660_v19  ;;  %v293_v41 = vld [vmem:[%s1035_s1 + $0x110] sm:$0xff] }
  0x89   :  { %397 = vmatpush.msra.mxu2 %v298_v28 }
  0x8a   :  { %605 = vrot.lane.b32.xlu2 %v604_v34, %s661_s0  ;;  %37 = vperm.xlu1 %594, %v707_v5   ;;  %v264_v34 = vld [vmem:[%s1035_s1 + $0x28] sm:$0xff] }
  0x8b   :  { %v176_v52 = vpop.permute.xlu2 %175  ;;  %398 = vmatpush.msra.mxu2 %v297_v30 }
  0x8c   :  { %vm186_vm10 = vcmp.eq.s32.totalorder %v176_v52, %v728_v17 }
  0x8d   :  { %v161_v48 = vpop.permute.xlu1 %160  ;;  %v554_v61 = vsel %vm186_vm10, 1.0, %v660_v19  ;;  %399 = vmatpush.msra.mxu2 %v296_v35 }
  0x8e   :  { %vm165_vm8 = vcmp.eq.s32.totalorder %v161_v48, %v728_v17  ;;  %558 = vmatmul.msk.f32.vlgmr.msra.gmra.mxu3 %vm246_vm11, %v554_v61  ;;  %v291_v48 = vld [vmem:[%s1035_s1 + $0x100] sm:$0xff] }
  0x8f   :  { %v553_v58 = vsel %vm165_vm8, 1.0, %v660_v19  ;;  %v32_v33 = vpop.permute.xlu0 %31  ;;  %400 = vmatpush.msra.mxu2 %v295_v37 }
  0x90   :  { %v614_v63 = vpack.i.bf16 %v553_v58, %v544_v59  ;;  %vm42_vm3 = vcmp.eq.s32.totalorder %v32_v33, %v728_v17 }
  0x91   :  { %401 = vmatpush.msra.mxu2 %v294_v39  ;;  %v484_v39 = vld [vmem:[%s1038_s4 + $0x28] sm:$0xff] }
  0x92   :  { %610 = vrot.lane.b32.xlu2 %v609_v51, %s661_s0  ;;  %596 = vset.pattern.permute.xlu1 %v658_v9 }
  0x93   :  { %85 = vperm.xlu1 %596, %v707_v5   ;;  %v179_v2 = vpop.permute.xlu2 %178  ;;  %v537_v5 = vsel %vm69_vm12, 1.0, %v660_v19  ;;  %402 = vmatpush.msra.mxu2 %v293_v41 }
  0x94   :  { %vm187_vm14 = vcmp.eq.s32.totalorder %v179_v2, %v728_v17  ;;  %502 = vmatpush.msrb.mxu3 %v484_v39 }
  0x95   :  { %v555_v10 = vsel %vm187_vm14, 1.0, %v660_v19  ;;  %403 = vmatpush.msra.mxu2 %v292_v46  ;;  %vm447_vm14 = vcmask 392192  }
  0x96   :  { %v113_v0 = vpop.permute.xlu1 %112  ;;  %559 = vmatmul.msk.f32.gmra.mxu3 %vm246_vm11, %v555_v10 }
  0x97   :  { %vm117_vm13 = vcmp.eq.s32.totalorder %v113_v0, %v728_v17  ;;  %404 = vmatpush.msra.mxu2 %v291_v48 }
  0x98   :  { %v545_v7 = vsel %vm117_vm13, 1.0, %v660_v19  ;;  %v131_v44 = vpop.permute.xlu0 %130 }
  0x99   :  { %v620_v12 = vpack.i.bf16 %v545_v7, %v537_v5  ;;  %vm139_vm6 = vcmp.eq.s32.totalorder %v131_v44, %v728_v17  ;;  %v316_v44 = vld [vmem:[%s1037_s3 + $0x8] sm:$0xff] }
  0x9a   :  { %615 = vrot.lane.b32.xlu2 %v614_v63, %s661_s0  ;;  %v530_v63 = vsel %vm42_vm3, 1.0, %v660_v19 }
  0x9b   :  { %597 = vset.pattern.permute.xlu1 %v657_v8  ;;  %v272_v8 = vld [vmem:[%s1035_s1 + $0x68] sm:$0xff] }
  0x9c   :  { %136 = vperm.xlu1 %597, %v715_v6   ;;  %333 = vmatpush.msra.mxu0 %v272_v8  ;;  %v934_v42 = vpop.permute.xlu2 %40 }
  0x9d   :  { %vm45_vm10 = vcmp.eq.s32.totalorder %v934_v42, %v728_v17 }
  0x9e   :  { %v533_v28 = vsel %vm45_vm10, 1.0, %v660_v19 }
  0x9f   :  { %v80_v32 = vpop.permute.xlu1 %79 }
  0xa0   :  { %vm90_vm15 = vcmp.eq.s32.totalorder %v80_v32, %v728_v17  ;;  %v134_v53 = vpop.permute.xlu0 %133 }
  0xa1   :  { %v538_v51 = vsel %vm90_vm15, 1.0, %v660_v19  ;;  %vm140_vm7 = vcmp.eq.s32.totalorder %v134_v53, %v728_v17  ;;  %vm458_vm15 = vcmask 392198  }
  0xa2   :  { %621 = vrot.lane.b32.xlu2 %v620_v12, %s661_s0  ;;  %v547_v12 = vsel %vm139_vm6, 1.0, %v660_v19  ;;  %s519_s0 = sshll.u32 %s662_s15, 4  ;;  %s520_s0 = int_to_ptr.vmem [resolvable:$true] %s519_s0 }
  0xa4   :  { %619 = vset.pattern.permute.xlu1 %v658_v9  ;;  %v271_v9 = vld [vmem:[%s1035_s1 + $0x60] sm:$0xff] }
  0xa5   :  { %88 = vperm.xlu1 %619, %v715_v6   ;;  %v275_v6 = vld [vmem:[%s1035_s1 + $0x80] sm:$0xff]  ;;  %334 = vmatpush.msra.mxu0 %v271_v9  ;;  %s521_s1 = sshll.u32 %s1040_s6, 4  ;;  %s522_s1 = int_to_ptr.hbm [resolvable:$true] %s521_s1 }
  0xa6   :  { %375 = vmatpush.msra.mxu1 %v275_v6  ;;  %v548_v6 = vsel %vm140_vm7, 1.0, %v660_v19 }
  0xa7   :  { %335 = vmatpush.msra.mxu0 %v270_v18 }
  0xa8   :  { %v35_v43 = vpop.permute.xlu1 %34 }
  0xa9   :  { %336 = vmatpush.msra.mxu0 %v269_v21  ;;  %v182_v58 = vpop.permute.xlu0 %181  ;;  %vm43_vm5 = vcmp.eq.s32.totalorder %v35_v43, %v728_v17 }
  0xaa   :  { %vm188_vm1 = vcmp.eq.s32.totalorder %v182_v58, %v728_v17  ;;  %v531_v11 = vsel %vm43_vm5, 1.0, %v660_v19  ;;  %v481_v58 = vld [vmem:[%s1038_s4 + $0x10] sm:$0xff] }
  0xab   :  { %337 = vmatpush.msra.mxu0 %v268_v23  ;;  %v556_v60 = vsel %vm188_vm1, 1.0, %v660_v19  ;;  %vm471_vm1 = vcmask 1040384  }
  0xac   :  { %560 = vmatmul.msk.f32.gmra.mxu3 %vm246_vm11, %v556_v60 }
  0xad   :  { %338 = vmatpush.msra.mxu0 %v267_v25 }
  0xaf   :  { %339 = vmatpush.msra.mxu0 %v266_v27 }
  0xb1   :  { %340 = vmatpush.msra.mxu0 %v265_v29  ;;  %v83_v52 = vpop.permute.xlu1 %82  ;;  %v185_v61 = vpop.permute.xlu0 %184 }
  0xb2   :  { %vm91_vm0 = vcmp.eq.s32.totalorder %v83_v52, %v728_v17  ;;  %vm189_vm2 = vcmp.eq.s32.totalorder %v185_v61, %v728_v17  ;;  %v483_v52 = vld [vmem:[%s1038_s4 + $0x20] sm:$0xff]  ;;  %v480_v61 = vld [vmem:[%s1038_s4 + $0x8] sm:$0xff] }
  0xb3   :  { %341 = vmatpush.msra.mxu0 %v264_v34  ;;  %v539_v56 = vsel %vm91_vm0, 1.0, %v660_v19  ;;  %v557_v62 = vsel %vm189_vm2, 1.0, %v660_v19  ;;  %503 = vmatpush.msrb.mxu3 %v483_v52  ;;  %vm461_vm0 = vcmask 388096   ;;  %vm512_vm2 = vcmask 25600  }
  0xb4   :  { %561 = vmatmul.msk.f32.gmra.mxu3 %vm246_vm11, %v557_v62 }
  0xb5   :  { %342 = vmatpush.msra.mxu0 %v263_v36 }
  0xb7   :  { %343 = vmatpush.msra.mxu0 %v262_v38 }
  0xb9   :  { %344 = vmatpush.msra.mxu0 %v261_v40 }
  0xbb   :  { %345 = vmatpush.msra.mxu0 %v260_v45 }
  0xbd   :  { %346 = vmatpush.msra.mxu0 %v259_v47 }
  0xdc   :  { %v601_v49 = vpop.permute.xlu2 %600 }
  0xdd   :  { %v602_v50 = vunpack.i.l.bf16 %v601_v49  ;;  %v603_v10 = vunpack.i.h.bf16 %v601_v49 }
  0xdf   :  { %v251_v54 = vsel %vm246_vm11, %v538_v51, %v602_v50  ;;  %v256_v15 = vsel %vm246_vm11, %v547_v12, %v603_v10 }
  0xe0   :  { %376 = vmatmul.f32.vlgmr.msra.gmra.mxu1 %v251_v54  ;;  %v317_v54 = vld [vmem:[%s1037_s3 + $0x10] sm:$0xff] }
  0xe4   :  { %v606_v55 = vpop.permute.xlu2 %605 }
  0xe5   :  { %v608_v57 = vunpack.i.h.bf16 %v606_v55  ;;  %v607_v31 = vunpack.i.l.bf16 %v606_v55 }
  0xe7   :  { %v252_v59 = vsel %vm246_vm11, %v539_v56, %v608_v57  ;;  %v248_v14 = vsel %vm246_vm11, %v531_v11, %v607_v31  ;;  %v482_v56 = vld [vmem:[%s1038_s4 + $0x18] sm:$0xff] }
  0xe8   :  { %379 = vmatmul.f32.gmra.mxu1 %v252_v59  ;;  %504 = vmatpush.msrb.mxu3 %v482_v56  ;;  %v318_v31 = vld [vmem:[%s1037_s3 + $0x18] sm:$0xf] }
  0xea   :  { %505 = vmatpush.msrb.mxu3 %v481_v58 }
  0xec   :  { %v611_v0 = vpop.permute.xlu2 %610  ;;  %506 = vmatpush.msrb.mxu3 %v480_v61 }
  0xed   :  { %v612_v9 = vunpack.i.l.bf16 %v611_v0  ;;  %v613_v18 = vunpack.i.h.bf16 %v611_v0  ;;  %v479_v0 = vld [vmem:[%s1038_s4] sm:$0xff] }
  0xee   :  { %507 = vmatpush.msrb.mxu3 %v479_v0 }
  0xef   :  { %v257_v24 = vsel %vm246_vm11, %v548_v6, %v612_v9 }
  0xf4   :  { %v591_v1 = vpop.permute.xlu1 %590  ;;  %v616_v8 = vpop.permute.xlu2 %615 }
  0xf5   :  { %v593_v2 = vunpack.i.h.bf16 %v591_v1  ;;  %v592_v3 = vunpack.i.l.bf16 %v591_v1  ;;  %v617_v21 = vunpack.i.l.bf16 %v616_v8  ;;  %v618_v30 = vunpack.i.h.bf16 %v616_v8 }
  0xf7   :  { %v247_v5 = vsel %vm246_vm11, %v530_v63, %v593_v2  ;;  %v255_v7 = vsel %vm246_vm11, %v546_v4, %v592_v3 }
  0xf8   :  { %347 = vmatmul.f32.vlgmr.msra.gmra.mxu0 %v247_v5  ;;  %405 = vmatmul.f32.vlgmr.msra.gmra.mxu2 %v255_v7 }
  0xfc   :  { %v38_v13 = vpop.permute.xlu1 %37  ;;  %v622_v25 = vpop.permute.xlu2 %621 }
  0xfd   :  { %vm44_vm8 = vcmp.eq.s32.totalorder %v38_v13, %v728_v17  ;;  %v623_v27 = vunpack.i.l.bf16 %v622_v25  ;;  %v624_v36 = vunpack.i.h.bf16 %v622_v25 }
  0xfe   :  { %v532_v16 = vsel %vm44_vm8, 1.0, %v660_v19 }
  0xff   :  { %v249_v23 = vsel %vm246_vm11, %v532_v16, %v613_v18  ;;  %v250_v32 = vsel %vm246_vm11, %v533_v28, %v623_v27 }
 0x100   :  { %350 = vmatmul.f32.gmra.mxu0 %v248_v14  ;;  %408 = vmatmul.f32.gmra.mxu2 %v256_v15 }
 0x105   :  { %v86_v20 = vpop.permute.xlu1 %85 }
 0x106   :  { %vm92_vm9 = vcmp.eq.s32.totalorder %v86_v20, %v728_v17 }
 0x107   :  { %v540_v22 = vsel %vm92_vm9, 1.0, %v660_v19 }
 0x108   :  { %353 = vmatmul.f32.gmra.mxu0 %v249_v23  ;;  %411 = vmatmul.f32.gmra.mxu2 %v257_v24  ;;  %v253_v26 = vsel %vm246_vm11, %v540_v22, %v617_v21 }
 0x109   :  { %382 = vmatmul.f32.gmra.mxu1 %v253_v26 }
 0x10e   :  { %v137_v29 = vpop.permute.xlu1 %136 }
 0x10f   :  { %vm141_vm12 = vcmp.eq.s32.totalorder %v137_v29, %v728_v17 }
 0x110   :  { %v549_v33 = vsel %vm141_vm12, 1.0, %v660_v19  ;;  %356 = vmatmul.f32.gmra.mxu0 %v250_v32 }
 0x111   :  { %v258_v34 = vsel %vm246_vm11, %v549_v33, %v618_v30  ;;  %v435_v43 = vpop.f32.mrf.mxu3 }
 0x112   :  { %414 = vmatmul.f32.gmra.mxu2 %v258_v34 }
 0x117   :  { %v89_v35 = vpop.permute.xlu1 %88 }
 0x118   :  { %vm93_vm13 = vcmp.eq.s32.totalorder %v89_v35, %v728_v17  ;;  %v315_v17 = vld [vmem:[%s1037_s3] sm:$0xff] }
 0x119   :  { %v541_v37 = vsel %vm93_vm13, 1.0, %v660_v19  ;;  %v438_v53 = vpop.f32.mrf.mxu3  ;;  %v625_v35 = vld [vmem:[%s1036_s2] ss:$0 sm:$0xff] }
 0x11a   :  { %v254_v38 = vsel %vm246_vm11, %v541_v37, %v624_v36  ;;  %vm449_vm11 = vcmask 390144  }
 0x11b   :  { %385 = vmatmul.f32.gmra.mxu1 %v254_v38 }
 0x12f   :  { %v441_v4 = vpop.f32.mrf.mxu3 }
 0x137   :  { %v444_v20 = vpop.f32.mrf.mxu3 }
 0x15d   :  { %v377_v42 = vpop.f32.mrf.mxu1 }
 0x165   :  { %v380_v47 = vpop.f32.mrf.mxu1 }
 0x175   :  { %v348_v40 = vpop.f32.mrf.mxu0 }
 0x176   :  { %v349_v46 = vadd.f32 %v348_v40, %v315_v17 }
 0x178   :  { %v378_v50 = vadd.f32 %v377_v42, %v349_v46 }
 0x17b   :  { %v406_v41 = vpop.f32.mrf.mxu2 }
 0x17c   :  { %v407_v57 = vadd.f32 %v406_v41, %v378_v50  ;;  %v626_v41 = vld [vmem:[%s1039_s5] ss:$0 sm:$0xff] }
 0x17d   :  { %v351_v45 = vpop.f32.mrf.mxu0 }
 0x17e   :  { %v352_v19 = vadd.f32 %v351_v45, %v316_v44  ;;  %v436_v63 = vadd.f32 %v435_v43, %v407_v57 }
 0x180   :  { %v381_v49 = vadd.f32 %v380_v47, %v352_v19  ;;  %v448_v7 = vsel %vm447_vm14, %v436_v63, -inf }
 0x183   :  { %v409_v48 = vpop.f32.mrf.mxu2 }
 0x184   :  { %v410_v51 = vadd.f32 %v409_v48, %v381_v49 }
 0x185   :  { %v354_v55 = vpop.f32.mrf.mxu0 }
 0x186   :  { %v439_v59 = vadd.f32 %v438_v53, %v410_v51  ;;  %v355_v60 = vadd.f32 %v354_v55, %v317_v54  ;;  %v383_v62 = vpop.f32.mrf.mxu1 }
 0x188   :  { %v450_v2 = vsel %vm449_vm11, %v439_v59, -inf  ;;  %v384_v3 = vadd.f32 %v383_v62, %v355_v60  ;;  %v459_v21 = vsel %vm458_vm15, %v439_v59, -inf }
 0x189   :  { %v451_v10 = vmax.f32 %v448_v7, %v450_v2 }
 0x18b   :  { %v412_v1 = vpop.f32.mrf.mxu2  ;;  %v452_v8 = vrot.slane %v451_v10, 4 }
 0x18c   :  { %v413_v5 = vadd.f32 %v412_v1, %v384_v3 }
 0x18d   :  { %v357_v11 = vpop.f32.mrf.mxu0  ;;  %v453_v18 = vmax.f32 %v451_v10, %v452_v8 }
 0x18e   :  { %v442_v12 = vadd.f32 %v441_v4, %v413_v5  ;;  %v358_v13 = vadd.f32 %v357_v11, %v318_v31 }
 0x18f   :  { %v454_v25 = vrot.slane %v453_v18, 2 }
 0x190   :  { %v460_v6 = vsel %vm447_vm14, %v442_v12, -inf }
 0x191   :  { %v463_v23 = vmax.f32 %v459_v21, %v460_v6  ;;  %v455_v28 = vmax.f32 %v453_v18, %v454_v25 }
 0x193   :  { %v456_v32 = vrot.slane %v455_v28, 1 }
 0x195   :  { %v415_v9 = vpop.f32.mrf.mxu2  ;;  %v457_v36 = vmax.f32 %v455_v28, %v456_v32 }
 0x198   :  { %v386_v14 = vpop.f32.mrf.mxu1 }
 0x199   :  { %v387_v15 = vadd.f32 %v386_v14, %v358_v13 }
 0x19b   :  { %v416_v16 = vadd.f32 %v415_v9, %v387_v15 }
 0x19d   :  { %v445_v22 = vadd.f32 %v444_v20, %v416_v16 }
 0x19f   :  { %v462_v24 = vsel %vm461_vm0, %v445_v22, -inf }
 0x1a0   :  { %v464_v26 = vmax.f32 %v463_v23, %v462_v24 }
 0x1a2   :  { %v465_v27 = vrot.slane %v464_v26, 4 }
 0x1a4   :  { %v466_v29 = vmax.f32 %v464_v26, %v465_v27 }
 0x1a6   :  { %v467_v30 = vrot.slane %v466_v29, 2 }
 0x1a8   :  { %v468_v33 = vmax.f32 %v466_v29, %v467_v30 }
 0x1aa   :  { %v469_v34 = vrot.slane %v468_v33, 1 }
 0x1ac   :  { %v470_v37 = vmax.f32 %v468_v33, %v469_v34 }
 0x1ae   :  { %v472_v38 = vsel %vm471_vm1, %v457_v36, %v470_v37 }
 0x1af   :  { %v477_v39 = vadd.f32 %v625_v35, %v472_v38 }
 0x1b1   :  { %v478_v40 = vmax.f32 %v477_v39, 0.0 }
 0x1b3   :  { %562 = vmatmul.msk.f32.vlgmr.msrb.gmra.mxu3 %vm447_vm14, %v478_v40 }
 0x236   :  { %v509_v42 = vpop.f32.mrf.mxu3 }
 0x237   :  { %v510_v43 = vadd.f32 %v626_v41, %v509_v42 }
 0x239   :  { %513 = vst.msk [vmem:[#allocation2] sm:$0x3] %vm512_vm2, %v510_v43 }
 0x23a   :  { %524 = dma.vmem_to_hbm [thread:$0]  %s520_s0, 32, %s522_s1, [#allocation3]  }
 0x23b   :  { %651 = dma.done.wait [#allocation3], 32  }
 0x23c   :  { %652 = vsyncadd [#allocation3], 4294967264 }
 0x23d   :  { %529 = vsyncpa [#allocation3], 1 }

</bundles_post_ra>
